<compile_context>
chip_gen: v6e
topology: v6e:2x2x1
jax: 0.10.0
libtpu: 0.0.40
codegen_flags: <defaults>
</compile_context>

<pallas_src>
import jax
import jax.numpy as jnp
from jax.experimental import pallas as pl
from jax.experimental.pallas import tpu as pltpu

_LANE = 128
_COL_CANDIDATES = (4096, 2048, 1024, 512, 256, 128)  # widest lane-dense slab first


def _mish_kernel(x_ref, o_ref):
    x = x_ref[...].astype(jnp.float32)
    # tanh(softplus(x)) = (e^{2x} + 2 e^x) / (e^{2x} + 2 e^x + 2).
    # Stable single-exp form with t = exp(-|x|):
    #   x >= 0:  (1 + 2t)   / (1 + 2t + 2t^2)
    #   x <  0:  (2t + t^2) / (2 + 2t + t^2)
    t = jnp.exp(-jnp.abs(x))
    pos = x >= 0.0
    numer = jnp.where(pos, 1.0 + 2.0 * t, t * (2.0 + t))
    denom = numer + jnp.where(pos, 2.0 * t * t, 2.0)      # denom in (1, 5]: never 0/inf
    inv = pl.reciprocal(denom, approx=True)                # EUP vrcp (~2^-12)
    inv = inv * (2.0 - denom * inv)                        # 1 Newton step (VPU) -> ~f32 exact
    o_ref[...] = (x * numer * inv).astype(o_ref.dtype)


def _default_block_bytes():
    """Per-generation streaming block size (bytes of the input block)."""
    try:
        kind = jax.devices()[0].device_kind.lower()
    except Exception:
        return 2 << 20
    if "v7" in kind or "7x" in kind:
        return 4 << 20   # v7x: 64 MiB VMEM/TC -> 16 MiB resident double-buffered
    if "v6" in kind:
        return 8 << 20   # v6e: 128 MiB VMEM -> amortize per-grid-step overhead
    return 2 << 20       # v5e & unknown: fits the 16 MiB scoped-VMEM default


def _row_tile(rows, cols, itemsize, target_block_bytes):
    """Row tile: ~target bytes/block, sublane-aligned, and >=2 grid blocks when possible."""
    sublane = max(8, 32 // itemsize)              # 8 for f32, 16 for bf16
    cols_padded = pl.cdiv(cols, _LANE) * _LANE    # VMEM lane padding of the block
    rt = max(sublane, target_block_bytes // (cols_padded * itemsize))
    rt = (rt // sublane) * sublane
    # Keep the grid at >= 2 blocks so both v7x TensorCores get work.
    if rows >= 2 * sublane:
        rt = min(rt, (rows // (2 * sublane)) * sublane)
    if rt >= rows:
        rt = rows                                  # full-rows block is always layout-legal
    return rt


def _compiler_params(block_vmem_bytes):
    # 2 double-buffers x (input + output) blocks, plus headroom for temporaries.
    resident = 4 * block_vmem_bytes
    vmem_limit = int(min(max(resident + (8 << 20), 16 << 20), 100 << 20))
    return pltpu.CompilerParams(
        dimension_semantics=("parallel",),
        vmem_limit_bytes=vmem_limit,
    )


def _run(x2d, rows, cols, row_tile, dtype, itemsize, n):
    grid = (pl.cdiv(rows, row_tile),)
    block_vmem = (pl.cdiv(row_tile, 8) * 8) * (pl.cdiv(cols, _LANE) * _LANE) * itemsize
    cost = pl.CostEstimate(
        flops=10 * n,
        transcendentals=2 * n,              # exp + approx reciprocal per element
        bytes_accessed=2 * n * itemsize,    # read + write once (mem-bound)
    )
    return pl.pallas_call(
        _mish_kernel,
        out_shape=jax.ShapeDtypeStruct((rows, cols), dtype),
        grid_spec=pltpu.PrefetchScalarGridSpec(
            num_scalar_prefetch=0,
            grid=grid,
            in_specs=[pl.BlockSpec((row_tile, cols), lambda i: (i, 0))],
            out_specs=pl.BlockSpec((row_tile, cols), lambda i: (i, 0)),
        ),
        compiler_params=_compiler_params(block_vmem),
        cost_estimate=cost,
    )(x2d)


def mish(x, *, target_block_bytes=None):
    """Elementwise Mish matching the PyTorch module's forward (any shape/dtype)."""
    orig_shape = x.shape
    dtype = x.dtype
    n = int(x.size)
    if n == 0:
        return x
    itemsize = jnp.dtype(dtype).itemsize
    if target_block_bytes is None:
        target_block_bytes = _default_block_bytes()

    if n % _LANE == 0:
        # Fast path: lane-dense 2D slab; unmasked vst on all but at most one step.
        flat = jnp.reshape(x, (-1,))
        cols = _LANE
        for c in _COL_CANDIDATES:
            if n % c == 0:
                cols = c
                break
        rows = n // cols
        x2d = jnp.reshape(flat, (rows, cols))
    else:
        # Ragged total size: no pad/slice HBM round trip.  Run on a
        # (leading, last-dim) 2D view; the block spans the full (ragged) last
        # dim, which is always layout-legal; Pallas masks the partial stores.
        # TODO(synk): large tensors with a ragged last dim keep masked,
        # non-lane-dense stores on every step; acceptable for small odd shapes.
        if x.ndim >= 2:
            cols = int(orig_shape[-1])
            rows = n // cols
        else:
            rows, cols = 1, n
        x2d = jnp.reshape(x, (rows, cols))

    row_tile = _row_tile(rows, cols, itemsize, target_block_bytes)
    out2d = _run(x2d, rows, cols, row_tile, dtype, itemsize, n)
    return jnp.reshape(out2d, orig_shape)


def _mish_reference(x):
    xf = x.astype(jnp.float32)
    return (xf * jnp.tanh(jax.nn.softplus(xf))).astype(x.dtype)


if __name__ == "__main__":
    key = jax.random.PRNGKey(0)

    # NCHW input, small shape (size divisible by 128 -> lane-dense fast path).
    x = jax.random.normal(key, (2, 4, 16, 16), dtype=jnp.float32) * 4.0
    y = jax.block_until_ready(mish(x))
    y_ref = _mish_reference(x)
    assert y.shape == x.shape and y.dtype == x.dtype
    assert jnp.allclose(y, y_ref, atol=1e-4, rtol=1e-4), "f32 mismatch vs reference"

    # Ragged size (not a multiple of 128) exercises the no-pad ragged path.
    x2 = jax.random.normal(jax.random.PRNGKey(0), (3, 5, 7), dtype=jnp.float32) * 3.0
    y2 = jax.block_until_ready(mish(x2))
    assert y2.shape == x2.shape
    assert jnp.allclose(y2, _mish_reference(x2), atol=1e-4, rtol=1e-4), "ragged mismatch"

    # bf16 path: f32 internal math, cast on store.
    xb = x.astype(jnp.bfloat16)
    yb = jax.block_until_ready(mish(xb))
    yb_ref = _mish_reference(xb)
    assert yb.dtype == jnp.bfloat16
    assert jnp.allclose(yb.astype(jnp.float32), yb_ref.astype(jnp.float32),
                        atol=2e-2, rtol=2e-2), "bf16 mismatch"

    print("KERNEL_OK")
</pallas_src>

<mosaic_0001>
module attributes {stable_mosaic.version = 11 : i64} {
  func.func @_mish_kernel(%arg0: i32, %arg1: memref<1x2048xf32, #tpu.memory_space<vmem>>, %arg2: memref<1x2048xf32, #tpu.memory_space<vmem>>) attributes {dimension_semantics = [#tpu.dimension_semantics<parallel>], iteration_bounds = array<i64: 1>, scalar_prefetch = 0 : i64, scratch_operands = 0 : i64, tpu.core_type = #tpu.core_type<tc>, window_params = [{transform_indices = @transform_0, window_bounds = array<i64: 1, 2048>}, {transform_indices = @transform_1, window_bounds = array<i64: 1, 2048>}]} {
    %c0 = arith.constant 0 : index
    %c0_0 = arith.constant 0 : index
    %0 = vector.load %arg1[%c0, %c0_0] : memref<1x2048xf32, #tpu.memory_space<vmem>>, vector<1x2048xf32>
    %1 = math.absf %0 : vector<1x2048xf32>
    %cst = arith.constant 0.000000e+00 : f32
    %2 = vector.broadcast %cst : f32 to vector<1x2048xf32>
    %3 = arith.subf %2, %1 : vector<1x2048xf32>
    %4 = math.exp %3 : vector<1x2048xf32>
    %cst_1 = arith.constant 0.000000e+00 : f32
    %5 = vector.broadcast %cst_1 : f32 to vector<1x2048xf32>
    %6 = arith.cmpf oge, %0, %5 : vector<1x2048xf32>
    %cst_2 = arith.constant 2.000000e+00 : f32
    %7 = vector.broadcast %cst_2 : f32 to vector<1x2048xf32>
    %8 = arith.mulf %7, %4 : vector<1x2048xf32>
    %cst_3 = arith.constant 1.000000e+00 : f32
    %9 = vector.broadcast %cst_3 : f32 to vector<1x2048xf32>
    %10 = arith.addf %9, %8 : vector<1x2048xf32>
    %cst_4 = arith.constant 2.000000e+00 : f32
    %11 = vector.broadcast %cst_4 : f32 to vector<1x2048xf32>
    %12 = arith.addf %11, %4 : vector<1x2048xf32>
    %13 = arith.mulf %4, %12 : vector<1x2048xf32>
    %14 = arith.select %6, %10, %13 : vector<1x2048xi1>, vector<1x2048xf32>
    %cst_5 = arith.constant 2.000000e+00 : f32
    %15 = vector.broadcast %cst_5 : f32 to vector<1x2048xf32>
    %16 = arith.mulf %15, %4 : vector<1x2048xf32>
    %17 = arith.mulf %16, %4 : vector<1x2048xf32>
    %cst_6 = arith.constant 2.000000e+00 : f32
    %18 = vector.broadcast %cst_6 : f32 to vector<1x2048xf32>
    %19 = arith.select %6, %17, %18 : vector<1x2048xi1>, vector<1x2048xf32>
    %20 = arith.addf %14, %19 : vector<1x2048xf32>
    %21 = tpu.reciprocal %20 {approx = true} : vector<1x2048xf32> -> vector<1x2048xf32>
    %22 = arith.mulf %20, %21 : vector<1x2048xf32>
    %cst_7 = arith.constant 2.000000e+00 : f32
    %23 = vector.broadcast %cst_7 : f32 to vector<1x2048xf32>
    %24 = arith.subf %23, %22 : vector<1x2048xf32>
    %25 = arith.mulf %21, %24 : vector<1x2048xf32>
    %26 = arith.mulf %0, %14 : vector<1x2048xf32>
    %27 = arith.mulf %26, %25 : vector<1x2048xf32>
    %c0_8 = arith.constant 0 : index
    %c0_9 = arith.constant 0 : index
    %28 = vector.load %arg2[%c0_8, %c0_9] : memref<1x2048xf32, #tpu.memory_space<vmem>>, vector<1x2048xf32>
    tpu.vector_store %arg2[%c0_8, %c0_9], %27 {strides = array<i32>} : memref<1x2048xf32, #tpu.memory_space<vmem>>, vector<1x2048xf32>,
    return
  }
  func.func @transform_0(%arg0: i32) -> (i32, i32) {
    %c0_i32 = arith.constant 0 : i32
    %c0_i32_0 = arith.constant 0 : i32
    return %arg0, %c0_i32 : i32, i32
  }
  func.func @transform_1(%arg0: i32) -> (i32, i32) {
    %c0_i32 = arith.constant 0 : i32
    %c0_i32_0 = arith.constant 0 : i32
    return %arg0, %c0_i32 : i32, i32
  }
}

</mosaic_0001>

<bundles_post_ra>
// kernel: tpu_custom_call.1
= control target key start
LH: loop header
LB: loop body
LE: loop exit
PB: predicated region body
PF: predicated region fallthrough
CT: control target
= control target key end

     0   :  { %6 = vsyncpa [#allocation3], 0  ;;  %s150_s0 = inlined_call_operand.hbm [shape: f32[1,2048], index: 0, kind: input, shape index: {}]   ;;  %s151_s1 = inlined_call_operand.hbm [shape: f32[1,2048], index: 1, kind: output, shape index: {}]  }
   0x1   :  { %7 = vsyncpa [#allocation4], 0  ;;  %s132_s6 = smov [#allocation2]  }
   0x2   :  { %s14_s7 = sshll.u32 %s132_s6, 4  ;;  %s15_s7 = int_to_ptr.vmem [resolvable:$true] %s14_s7 }
   0x3   :  { %s96_s8 = scalar_lea.vmem %s15_s7, 256  ;;  %p101_p1 = scmp.lt.s32.totalorder %s15_s7, %s15_s7 }
   0x4   :  { %p97_p0 = scmp.ne.s32.totalorder %s15_s7, %s96_s8  ;;  %p102_p2 = scmp.lt.s32.totalorder %s96_s8, %s96_s8 }
   0x6   :  { %p103_p3 = por %p102_p2, %p101_p1 }
   0x8   :  { %p104_p4 = pnand %p103_p3, %p97_p0 }
   0xa   :  { %107 = shalt.err (!%p104_p4)
}
   0xb   :  { %17 = dma.hbm_to_vmem [thread:$0]  %s150_s0, 256, %s15_s7, [#allocation3]  }
   0xc   :  { %128 = dma.done.wait [#allocation3], 256  }
   0xd   :  { %129 = vsyncadd [#allocation3], 4294967040  ;;  %v21_v0 = vld [vmem:[#allocation2] sm:$0xff]  ;;  %v22_v1 = vld [vmem:[#allocation2 + $0x8] sm:$0xff]  ;;  %s133_s0 = smov [#allocation5]  }
   0xe   :  { %v23_v2 = vand.u32 2147483647, %v21_v0  ;;  %v24_v3 = vand.u32 2147483647, %v22_v1  ;;  %vm31_vm0 = vcmp.ge.f32.partialorder %v21_v0, 0.0  ;;  %vm32_vm1 = vcmp.ge.f32.partialorder %v22_v1, 0.0 }
   0xf   :  { %s69_s11 = sshll.u32 %s133_s0, 4  ;;  %s70_s11 = int_to_ptr.vmem [resolvable:$true] %s69_s11 }
  0x10   :  { %v25_v4 = vsub.f32 0.0, %v23_v2  ;;  %v26_v5 = vsub.f32 0.0, %v24_v3  ;;  %s108_s12 = scalar_lea.vmem %s70_s11, 256  ;;  %p113_p6 = scmp.lt.s32.totalorder %s70_s11, %s70_s11 }
  0x11   :  { %p109_p5 = scmp.ne.s32.totalorder %s70_s11, %s108_s12  ;;  %p114_p7 = scmp.lt.s32.totalorder %s108_s12, %s108_s12 }
  0x12   :  { %v27_v6 = vmul.f32 1.442695, %v25_v4  ;;  %v29_v7 = vmul.f32 1.442695, %v26_v5 }
  0x13   :  { %p115_p8 = por %p114_p7, %p113_p6 }
  0x14   :  { %80 = vpow2.f32 %v27_v6 }
  0x15   :  { %82 = vpow2.f32 %v29_v7  ;;  %p116_p9 = pnand %p115_p8, %p109_p5 }
  0x21   :  { %v81_v8 = vpop.eup %80 }
  0x22   :  { %v83_v9 = vpop.eup %82  ;;  %v33_v10 = vmul.f32 2.0, %v81_v8  ;;  %v37_v11 = vadd.f32 2.0, %v81_v8 }
  0x23   :  { %v34_v12 = vmul.f32 2.0, %v83_v9  ;;  %v38_v13 = vadd.f32 2.0, %v83_v9 }
  0x24   :  { %v35_v14 = vadd.f32 1.0, %v33_v10  ;;  %v39_v15 = vmul.f32 %v81_v8, %v37_v11  ;;  %v43_v16 = vmul.f32 %v81_v8, %v33_v10 }
  0x25   :  { %v36_v17 = vadd.f32 1.0, %v34_v12  ;;  %v40_v18 = vmul.f32 %v83_v9, %v38_v13  ;;  %v44_v19 = vmul.f32 %v83_v9, %v34_v12 }
  0x26   :  { %v41_v20 = vsel %vm31_vm0, %v35_v14, %v39_v15  ;;  %v45_v21 = vsel %vm31_vm0, %v43_v16, 2.0 }
  0x27   :  { %v47_v22 = vadd.f32 %v45_v21, %v41_v20  ;;  %v42_v23 = vsel %vm32_vm1, %v36_v17, %v40_v18  ;;  %v46_v24 = vsel %vm32_vm1, %v44_v19, 2.0  ;;  %v57_v31 = vmul.f32 %v41_v20, %v21_v0 }
  0x28   :  { %v48_v25 = vadd.f32 %v46_v24, %v42_v23  ;;  %v58_v33 = vmul.f32 %v42_v23, %v22_v1 }
  0x29   :  { %84 = vrcp.f32 %v47_v22 }
  0x2a   :  { %86 = vrcp.f32 %v48_v25 }
  0x36   :  { %v85_v26 = vpop.eup %84 }
  0x37   :  { %v87_v27 = vpop.eup %86  ;;  %v51_v28 = vmul.f32 %v85_v26, %v47_v22 }
  0x38   :  { %v52_v29 = vmul.f32 %v87_v27, %v48_v25 }
  0x39   :  { %v53_v30 = vsub.f32 2.0, %v51_v28 }
  0x3a   :  { %v54_v32 = vsub.f32 2.0, %v52_v29 }
  0x3b   :  { %v55_v34 = vmul.f32 %v85_v26, %v53_v30 }
  0x3c   :  { %v56_v35 = vmul.f32 %v87_v27, %v54_v32 }
  0x3d   :  { %v59_v36 = vmul.f32 %v57_v31, %v55_v34 }
  0x3e   :  { %v60_v37 = vmul.f32 %v58_v33, %v56_v35 }
  0x3f   :  { %61 = vst [vmem:[#allocation5] sm:$0xff] %v59_v36 }
  0x40   :  { %62 = vst [vmem:[#allocation5 + $0x8] sm:$0xff] %v60_v37 }
  0x41   :  { %119 = shalt.err (!%p116_p9)
}
  0x42   :  { %72 = dma.vmem_to_hbm [thread:$0]  %s70_s11, 256, %s151_s1, [#allocation4]  }
  0x43   :  { %130 = dma.done.wait [#allocation4], 256  }
  0x44   :  { %131 = vsyncadd [#allocation4], 4294967040 }
  0x45   :  { %76 = vsyncpa [#allocation3], 1 }
  0x46   :  { %77 = vsyncpa [#allocation4], 1 }

</bundles_post_ra>
